<compile_context>
chip_gen: v7x
topology: tpu7x:2x2x1
jax: 0.10.0
libtpu: 0.0.40
codegen_flags: <defaults>
</compile_context>

<pallas_src>
import functools

import jax
import jax.numpy as jnp
from jax.experimental import pallas as pl
from jax.experimental.pallas import tpu as pltpu


def _euler_kernel(x0_ref, u_ref, w1x_ref, w1u_ref, b1_ref, w2_ref, b2_ref,
                  out_ref, c_ref, x_ref, *, dt, Tc, Bb):
    n_x = out_ref.shape[2]
    n_u = u_ref.shape[2]
    H = c_ref.shape[2]

    # ---- Initialize the carried state at the first time chunk of this batch
    # block (time axis is the innermost, "arbitrary" grid dimension). ----------
    @pl.when(pl.program_id(1) == 0)
    def _():
        x_ref[...] = x0_ref[...].astype(jnp.float32)

    # ---- Per-chunk input drive: one MXU pass for all Tc steps of this chunk --
    #   c[t, :, :] = u[t] @ W1u + b1
    u2d = u_ref[...].reshape(Tc * Bb, n_u)            # leading-dim merge (Bb=8 aligned)
    c2d = (jnp.dot(u2d, w1u_ref[...], preferred_element_type=jnp.float32)
           + b1_ref[...])
    c_ref[...] = c2d.reshape(Tc, Bb, H)

    # Loop-invariant weights / broadcasts, dt folded into W2/b2 (cheap, per chunk).
    dt_f = jnp.float32(dt)
    w1x = w1x_ref[...]                                 # (n_x, H)
    w2_dt = w2_ref[...] * dt_f                         # (H, n_x)
    b2_dt = jnp.broadcast_to(b2_ref[...], (Bb, n_x)) * dt_f

    # ---- Serial Euler recurrence over this time chunk ------------------------
    def body(t, x):
        h = jnp.tanh(
            jnp.dot(x, w1x, preferred_element_type=jnp.float32) + c_ref[t]
        )
        # x_{k+1} = x_k + dt * (h @ W2 + b2)   (dt pre-folded into W2/b2)
        x_new = x + (jnp.dot(h, w2_dt, preferred_element_type=jnp.float32)
                     + b2_dt)
        out_ref[t] = x_new.astype(out_ref.dtype)
        return x_new

    x_final = jax.lax.fori_loop(0, Tc, body, x_ref[...], unroll=True)
    x_ref[...] = x_final                               # carry to next time chunk


def forward_euler(x0, u, w1x, w1u, b1, w2, b2, dt, *,
                  time_chunk=4, batch_block=None):
    """x0: [B, n_x], u: [T, B, n_u] -> xhat: [T, B, n_x]."""
    T, B, n_u = u.shape
    _, n_x = x0.shape
    H = w1x.shape[1]

    # Time chunk Tc: largest value <= time_chunk that divides T.
    Tc = max(1, min(int(time_chunk), T))
    while T % Tc:
        Tc -= 1
    n_t = T // Tc

    # Batch block Bb: sublane-aligned (multiple of 8) divisor of B when possible;
    # multiple batch blocks feed the leading "parallel" grid axis (v7x megacore).
    if batch_block is not None and B % batch_block == 0 and batch_block % 8 == 0:
        Bb = int(batch_block)
    else:
        Bb = B
    n_b = B // Bb

    kernel = functools.partial(_euler_kernel, dt=float(dt), Tc=Tc, Bb=Bb)

    # Explicit VMEM budget (bytes): double-buffered u/out chunks + scratches +
    # weights, with headroom; floor 16 MiB, cap 48 MiB (safe on v7x's 64 MiB).
    elt = 4
    need = (2 * Tc * Bb * n_u * elt          # u chunk, double-buffered
            + 2 * Tc * Bb * n_x * elt        # out chunk, double-buffered
            + Tc * Bb * H * 4                # c scratch
            + Bb * n_x * 4                   # state carry
            + 2 * Bb * n_x * elt             # x0 block
            + 2 * (n_x * H + n_u * H + H + H * n_x + n_x) * elt)  # params
    vmem_limit = int(min(max(4 * need, 16 << 20), 48 << 20))

    return pl.pallas_call(
        kernel,
        out_shape=jax.ShapeDtypeStruct((T, B, n_x), x0.dtype),
        grid_spec=pltpu.PrefetchScalarGridSpec(
            num_scalar_prefetch=0,
            grid=(n_b, n_t),  # (batch blocks: parallel, time chunks: serial carry)
            in_specs=[
                pl.BlockSpec((Bb, n_x), lambda b, t: (b, 0)),           # x0
                pl.BlockSpec((Tc, Bb, n_u), lambda b, t: (t, b, 0)),    # u chunk
                pl.BlockSpec((n_x, H), lambda b, t: (0, 0)),            # W1x
                pl.BlockSpec((n_u, H), lambda b, t: (0, 0)),            # W1u
                pl.BlockSpec((1, H), lambda b, t: (0, 0)),              # b1
                pl.BlockSpec((H, n_x), lambda b, t: (0, 0)),            # W2
                pl.BlockSpec((1, n_x), lambda b, t: (0, 0)),            # b2
            ],
            out_specs=pl.BlockSpec((Tc, Bb, n_x), lambda b, t: (t, b, 0)),
            scratch_shapes=[
                pltpu.VMEM((Tc, Bb, H), jnp.float32),   # per-chunk input drive
                pltpu.VMEM((Bb, n_x), jnp.float32),     # Euler state carry
            ],
        ),
        compiler_params=pltpu.CompilerParams(
            dimension_semantics=("parallel", "arbitrary"),
            vmem_limit_bytes=vmem_limit,
        ),
    )(x0, u, w1x, w1u, b1, w2, b2)


def _reference(x0, u, w1x, w1u, b1, w2, b2, dt):
    def step(x, u_t):
        dx = jnp.tanh(x @ w1x + u_t @ w1u + b1) @ w2 + b2
        x_new = x + dx * dt
        return x_new, x_new
    _, xs = jax.lax.scan(step, x0, u)
    return xs


if __name__ == "__main__":
    key = jax.random.PRNGKey(0)
    # B=16 / Bb=8 exercises multiple batch blocks on the parallel axis;
    # T=8 / Tc=4 exercises the state carry across time chunks.
    B, n_x, n_u, H, T = 16, 4, 3, 32, 8
    dt = 0.1

    k0, k1, k2, k3, k4, k5, k6 = jax.random.split(key, 7)
    x0 = jax.random.normal(k0, (B, n_x), dtype=jnp.float32)
    u = jax.random.normal(k1, (T, B, n_u), dtype=jnp.float32)

    # Deterministic parameter init for the inner state-space MLP.
    w1x = 0.1 * jax.random.normal(k2, (n_x, H), dtype=jnp.float32)
    w1u = 0.1 * jax.random.normal(k3, (n_u, H), dtype=jnp.float32)
    b1 = 0.01 * jax.random.normal(k4, (1, H), dtype=jnp.float32)
    w2 = 0.1 * jax.random.normal(k5, (H, n_x), dtype=jnp.float32)
    b2 = 0.01 * jax.random.normal(k6, (1, n_x), dtype=jnp.float32)

    xhat = forward_euler(x0, u, w1x, w1u, b1, w2, b2, dt,
                         time_chunk=4, batch_block=8)
    xhat = jax.block_until_ready(xhat)

    ref = _reference(x0, u, w1x, w1u, b1[0], w2, b2[0], dt)
    assert xhat.shape == (T, B, n_x)
    assert jnp.allclose(xhat, ref, atol=1e-5, rtol=1e-5)

    print("KERNEL_OK")
</pallas_src>

<mosaic_0001>
module attributes {stable_mosaic.version = 11 : i64} {
  func.func @_euler_kernel(%arg0: i32, %arg1: i32, %arg2: memref<8x4xf32, #tpu.memory_space<vmem>>, %arg3: memref<4x8x3xf32, #tpu.memory_space<vmem>>, %arg4: memref<4x32xf32, #tpu.memory_space<vmem>>, %arg5: memref<3x32xf32, #tpu.memory_space<vmem>>, %arg6: memref<1x32xf32, #tpu.memory_space<vmem>>, %arg7: memref<32x4xf32, #tpu.memory_space<vmem>>, %arg8: memref<1x4xf32, #tpu.memory_space<vmem>>, %arg9: memref<4x8x4xf32, #tpu.memory_space<vmem>>, %arg10: memref<4x8x32xf32, #tpu.memory_space<vmem>>, %arg11: memref<8x4xf32, #tpu.memory_space<vmem>>) attributes {dimension_semantics = [#tpu.dimension_semantics<parallel>, #tpu.dimension_semantics<arbitrary>], iteration_bounds = array<i64: 2, 2>, scalar_prefetch = 0 : i64, scratch_operands = 2 : i64, tpu.core_type = #tpu.core_type<tc>, window_params = [{transform_indices = @transform_0, window_bounds = array<i64: 8, 4>}, {transform_indices = @transform_1, window_bounds = array<i64: 4, 8, 3>}, {pipeline_mode = #tpu.pipeline_mode<synchronous>, transform_indices = @transform_2, window_bounds = array<i64: 4, 32>}, {pipeline_mode = #tpu.pipeline_mode<synchronous>, transform_indices = @transform_3, window_bounds = array<i64: 3, 32>}, {pipeline_mode = #tpu.pipeline_mode<synchronous>, transform_indices = @transform_4, window_bounds = array<i64: 1, 32>}, {pipeline_mode = #tpu.pipeline_mode<synchronous>, transform_indices = @transform_5, window_bounds = array<i64: 32, 4>}, {pipeline_mode = #tpu.pipeline_mode<synchronous>, transform_indices = @transform_6, window_bounds = array<i64: 1, 4>}, {transform_indices = @transform_7, window_bounds = array<i64: 4, 8, 4>}]} {
    %c0_i32 = arith.constant 0 : i32
    %0 = arith.cmpi eq, %arg1, %c0_i32 : i32
    %1 = arith.extui %0 : i1 to i32
    %c0_i32_0 = arith.constant 0 : i32
    %2 = arith.cmpi ne, %1, %c0_i32_0 : i32
    scf.if %2 {
      %c0_47 = arith.constant 0 : index
      %c0_48 = arith.constant 0 : index
      %75 = vector.load %arg2[%c0_47, %c0_48] : memref<8x4xf32, #tpu.memory_space<vmem>>, vector<8x4xf32>
      %c0_49 = arith.constant 0 : index
      %c0_50 = arith.constant 0 : index
      %76 = vector.load %arg11[%c0_49, %c0_50] : memref<8x4xf32, #tpu.memory_space<vmem>>, vector<8x4xf32>
      tpu.vector_store %arg11[%c0_49, %c0_50], %75 {strides = array<i32>} : memref<8x4xf32, #tpu.memory_space<vmem>>, vector<8x4xf32>,
    } else {
    }
    %c0 = arith.constant 0 : index
    %c0_1 = arith.constant 0 : index
    %c0_2 = arith.constant 0 : index
    %3 = vector.load %arg3[%c0, %c0_1, %c0_2] : memref<4x8x3xf32, #tpu.memory_space<vmem>>, vector<4x8x3xf32>
    %4 = vector.shape_cast %3 : vector<4x8x3xf32> to vector<32x3xf32>
    %c0_3 = arith.constant 0 : index
    %c0_4 = arith.constant 0 : index
    %5 = vector.load %arg5[%c0_3, %c0_4] : memref<3x32xf32, #tpu.memory_space<vmem>>, vector<3x32xf32>
    %cst = arith.constant dense<0.000000e+00> : vector<32x32xf32>
    %6 = tpu.matmul %4, %5, %cst {dimension_numbers = #tpu.dot_dimension_numbers<[1], [0], [0], [1], [0, 0, 1, 1], [], []>} : vector<32x3xf32>, vector<3x32xf32>, vector<32x32xf32> -> vector<32x32xf32>
    %c0_5 = arith.constant 0 : index
    %c0_6 = arith.constant 0 : index
    %7 = vector.load %arg6[%c0_5, %c0_6] : memref<1x32xf32, #tpu.memory_space<vmem>>, vector<1x32xf32>
    %8 = vector.broadcast %7 : vector<1x32xf32> to vector<32x32xf32>
    %9 = arith.addf %6, %8 : vector<32x32xf32>
    %10 = vector.shape_cast %9 : vector<32x32xf32> to vector<4x8x32xf32>
    %c0_7 = arith.constant 0 : index
    %c0_8 = arith.constant 0 : index
    %c0_9 = arith.constant 0 : index
    %11 = vector.load %arg10[%c0_7, %c0_8, %c0_9] : memref<4x8x32xf32, #tpu.memory_space<vmem>>, vector<4x8x32xf32>
    tpu.vector_store %arg10[%c0_7, %c0_8, %c0_9], %10 {strides = array<i32>} : memref<4x8x32xf32, #tpu.memory_space<vmem>>, vector<4x8x32xf32>,
    %c0_10 = arith.constant 0 : index
    %c0_11 = arith.constant 0 : index
    %12 = vector.load %arg4[%c0_10, %c0_11] : memref<4x32xf32, #tpu.memory_space<vmem>>, vector<4x32xf32>
    %c0_12 = arith.constant 0 : index
    %c0_13 = arith.constant 0 : index
    %13 = vector.load %arg7[%c0_12, %c0_13] : memref<32x4xf32, #tpu.memory_space<vmem>>, vector<32x4xf32>
    %cst_14 = arith.constant 1.000000e-01 : f32
    %14 = vector.broadcast %cst_14 : f32 to vector<32x4xf32>
    %15 = arith.mulf %13, %14 : vector<32x4xf32>
    %c0_15 = arith.constant 0 : index
    %c0_16 = arith.constant 0 : index
    %16 = vector.load %arg8[%c0_15, %c0_16] : memref<1x4xf32, #tpu.memory_space<vmem>>, vector<1x4xf32>
    %17 = vector.shape_cast %16 : vector<1x4xf32> to vector<1x4xf32>
    %18 = vector.broadcast %17 : vector<1x4xf32> to vector<8x4xf32>
    %cst_17 = arith.constant 1.000000e-01 : f32
    %19 = vector.broadcast %cst_17 : f32 to vector<8x4xf32>
    %20 = arith.mulf %18, %19 : vector<8x4xf32>
    %c0_18 = arith.constant 0 : index
    %c0_19 = arith.constant 0 : index
    %21 = vector.load %arg11[%c0_18, %c0_19] : memref<8x4xf32, #tpu.memory_space<vmem>>, vector<8x4xf32>
    %c0_i32_20 = arith.constant 0 : i32
    %cst_21 = arith.constant dense<0.000000e+00> : vector<8x32xf32>
    %22 = tpu.matmul %21, %12, %cst_21 {dimension_numbers = #tpu.dot_dimension_numbers<[1], [0], [0], [1], [0, 0, 1, 1], [], []>} : vector<8x4xf32>, vector<4x32xf32>, vector<8x32xf32> -> vector<8x32xf32>
    %23 = arith.index_cast %c0_i32_20 : i32 to index
    %c0_22 = arith.constant 0 : index
    %c0_23 = arith.constant 0 : index
    %24 = vector.load %arg10[%23, %c0_22, %c0_23] : memref<4x8x32xf32, #tpu.memory_space<vmem>>, vector<1x8x32xf32>
    %25 = vector.shape_cast %24 : vector<1x8x32xf32> to vector<8x32xf32>
    %26 = arith.addf %22, %25 : vector<8x32xf32>
    %27 = math.tanh %26 : vector<8x32xf32>
    %cst_24 = arith.constant dense<0.000000e+00> : vector<8x4xf32>
    %28 = tpu.matmul %27, %15, %cst_24 {dimension_numbers = #tpu.dot_dimension_numbers<[1], [0], [0], [1], [0, 0, 1, 1], [], []>} : vector<8x32xf32>, vector<32x4xf32>, vector<8x4xf32> -> vector<8x4xf32>
    %29 = arith.addf %28, %20 : vector<8x4xf32>
    %30 = arith.addf %21, %29 : vector<8x4xf32>
    %31 = arith.index_cast %c0_i32_20 : i32 to index
    %c0_25 = arith.constant 0 : index
    %c0_26 = arith.constant 0 : index
    %32 = vector.load %arg9[%31, %c0_25, %c0_26] : memref<4x8x4xf32, #tpu.memory_space<vmem>>, vector<1x8x4xf32>
    %33 = vector.shape_cast %32 : vector<1x8x4xf32> to vector<8x4xf32>
    %34 = vector.shape_cast %30 : vector<8x4xf32> to vector<1x8x4xf32>
    tpu.vector_store %arg9[%31, %c0_25, %c0_26], %34 {strides = array<i32>} : memref<4x8x4xf32, #tpu.memory_space<vmem>>, vector<1x8x4xf32>,
    %c1_i32 = arith.constant 1 : i32
    %cst_27 = arith.constant dense<0.000000e+00> : vector<8x32xf32>
    %35 = tpu.matmul %30, %12, %cst_27 {dimension_numbers = #tpu.dot_dimension_numbers<[1], [0], [0], [1], [0, 0, 1, 1], [], []>} : vector<8x4xf32>, vector<4x32xf32>, vector<8x32xf32> -> vector<8x32xf32>
    %36 = arith.index_cast %c1_i32 : i32 to index
    %c0_28 = arith.constant 0 : index
    %c0_29 = arith.constant 0 : index
    %37 = vector.load %arg10[%36, %c0_28, %c0_29] : memref<4x8x32xf32, #tpu.memory_space<vmem>>, vector<1x8x32xf32>
    %38 = vector.shape_cast %37 : vector<1x8x32xf32> to vector<8x32xf32>
    %39 = arith.addf %35, %38 : vector<8x32xf32>
    %40 = math.tanh %39 : vector<8x32xf32>
    %cst_30 = arith.constant dense<0.000000e+00> : vector<8x4xf32>
    %41 = tpu.matmul %40, %15, %cst_30 {dimension_numbers = #tpu.dot_dimension_numbers<[1], [0], [0], [1], [0, 0, 1, 1], [], []>} : vector<8x32xf32>, vector<32x4xf32>, vector<8x4xf32> -> vector<8x4xf32>
    %42 = arith.addf %41, %20 : vector<8x4xf32>
    %43 = arith.addf %30, %42 : vector<8x4xf32>
    %44 = arith.index_cast %c1_i32 : i32 to index
    %c0_31 = arith.constant 0 : index
    %c0_32 = arith.constant 0 : index
    %45 = vector.load %arg9[%44, %c0_31, %c0_32] : memref<4x8x4xf32, #tpu.memory_space<vmem>>, vector<1x8x4xf32>
    %46 = vector.shape_cast %45 : vector<1x8x4xf32> to vector<8x4xf32>
    %47 = vector.shape_cast %43 : vector<8x4xf32> to vector<1x8x4xf32>
    tpu.vector_store %arg9[%44, %c0_31, %c0_32], %47 {strides = array<i32>} : memref<4x8x4xf32, #tpu.memory_space<vmem>>, vector<1x8x4xf32>,
    %c2_i32 = arith.constant 2 : i32
    %cst_33 = arith.constant dense<0.000000e+00> : vector<8x32xf32>
    %48 = tpu.matmul %43, %12, %cst_33 {dimension_numbers = #tpu.dot_dimension_numbers<[1], [0], [0], [1], [0, 0, 1, 1], [], []>} : vector<8x4xf32>, vector<4x32xf32>, vector<8x32xf32> -> vector<8x32xf32>
    %49 = arith.index_cast %c2_i32 : i32 to index
    %c0_34 = arith.constant 0 : index
    %c0_35 = arith.constant 0 : index
    %50 = vector.load %arg10[%49, %c0_34, %c0_35] : memref<4x8x32xf32, #tpu.memory_space<vmem>>, vector<1x8x32xf32>
    %51 = vector.shape_cast %50 : vector<1x8x32xf32> to vector<8x32xf32>
    %52 = arith.addf %48, %51 : vector<8x32xf32>
    %53 = math.tanh %52 : vector<8x32xf32>
    %cst_36 = arith.constant dense<0.000000e+00> : vector<8x4xf32>
    %54 = tpu.matmul %53, %15, %cst_36 {dimension_numbers = #tpu.dot_dimension_numbers<[1], [0], [0], [1], [0, 0, 1, 1], [], []>} : vector<8x32xf32>, vector<32x4xf32>, vector<8x4xf32> -> vector<8x4xf32>
    %55 = arith.addf %54, %20 : vector<8x4xf32>
    %56 = arith.addf %43, %55 : vector<8x4xf32>
    %57 = arith.index_cast %c2_i32 : i32 to index
    %c0_37 = arith.constant 0 : index
    %c0_38 = arith.constant 0 : index
    %58 = vector.load %arg9[%57, %c0_37, %c0_38] : memref<4x8x4xf32, #tpu.memory_space<vmem>>, vector<1x8x4xf32>
    %59 = vector.shape_cast %58 : vector<1x8x4xf32> to vector<8x4xf32>
    %60 = vector.shape_cast %56 : vector<8x4xf32> to vector<1x8x4xf32>
    tpu.vector_store %arg9[%57, %c0_37, %c0_38], %60 {strides = array<i32>} : memref<4x8x4xf32, #tpu.memory_space<vmem>>, vector<1x8x4xf32>,
    %c3_i32 = arith.constant 3 : i32
    %cst_39 = arith.constant dense<0.000000e+00> : vector<8x32xf32>
    %61 = tpu.matmul %56, %12, %cst_39 {dimension_numbers = #tpu.dot_dimension_numbers<[1], [0], [0], [1], [0, 0, 1, 1], [], []>} : vector<8x4xf32>, vector<4x32xf32>, vector<8x32xf32> -> vector<8x32xf32>
    %62 = arith.index_cast %c3_i32 : i32 to index
    %c0_40 = arith.constant 0 : index
    %c0_41 = arith.constant 0 : index
    %63 = vector.load %arg10[%62, %c0_40, %c0_41] : memref<4x8x32xf32, #tpu.memory_space<vmem>>, vector<1x8x32xf32>
    %64 = vector.shape_cast %63 : vector<1x8x32xf32> to vector<8x32xf32>
    %65 = arith.addf %61, %64 : vector<8x32xf32>
    %66 = math.tanh %65 : vector<8x32xf32>
    %cst_42 = arith.constant dense<0.000000e+00> : vector<8x4xf32>
    %67 = tpu.matmul %66, %15, %cst_42 {dimension_numbers = #tpu.dot_dimension_numbers<[1], [0], [0], [1], [0, 0, 1, 1], [], []>} : vector<8x32xf32>, vector<32x4xf32>, vector<8x4xf32> -> vector<8x4xf32>
    %68 = arith.addf %67, %20 : vector<8x4xf32>
    %69 = arith.addf %56, %68 : vector<8x4xf32>
    %70 = arith.index_cast %c3_i32 : i32 to index
    %c0_43 = arith.constant 0 : index
    %c0_44 = arith.constant 0 : index
    %71 = vector.load %arg9[%70, %c0_43, %c0_44] : memref<4x8x4xf32, #tpu.memory_space<vmem>>, vector<1x8x4xf32>
    %72 = vector.shape_cast %71 : vector<1x8x4xf32> to vector<8x4xf32>
    %73 = vector.shape_cast %69 : vector<8x4xf32> to vector<1x8x4xf32>
    tpu.vector_store %arg9[%70, %c0_43, %c0_44], %73 {strides = array<i32>} : memref<4x8x4xf32, #tpu.memory_space<vmem>>, vector<1x8x4xf32>,
    %c4_i32 = arith.constant 4 : i32
    %c0_45 = arith.constant 0 : index
    %c0_46 = arith.constant 0 : index
    %74 = vector.load %arg11[%c0_45, %c0_46] : memref<8x4xf32, #tpu.memory_space<vmem>>, vector<8x4xf32>
    tpu.vector_store %arg11[%c0_45, %c0_46], %69 {strides = array<i32>} : memref<8x4xf32, #tpu.memory_space<vmem>>, vector<8x4xf32>,
    return
  }
  func.func @transform_0(%arg0: i32, %arg1: i32) -> (i32, i32) {
    %c0_i32 = arith.constant 0 : i32
    %c0_i32_0 = arith.constant 0 : i32
    return %arg0, %c0_i32 : i32, i32
  }
  func.func @transform_1(%arg0: i32, %arg1: i32) -> (i32, i32, i32) {
    %c0_i32 = arith.constant 0 : i32
    %c0_i32_0 = arith.constant 0 : i32
    return %arg1, %arg0, %c0_i32 : i32, i32, i32
  }
  func.func @transform_2(%arg0: i32, %arg1: i32) -> (i32, i32) {
    %c0_i32 = arith.constant 0 : i32
    %c0_i32_0 = arith.constant 0 : i32
    %c0_i32_1 = arith.constant 0 : i32
    return %c0_i32, %c0_i32_0 : i32, i32
  }
  func.func @transform_3(%arg0: i32, %arg1: i32) -> (i32, i32) {
    %c0_i32 = arith.constant 0 : i32
    %c0_i32_0 = arith.constant 0 : i32
    %c0_i32_1 = arith.constant 0 : i32
    return %c0_i32, %c0_i32_0 : i32, i32
  }
  func.func @transform_4(%arg0: i32, %arg1: i32) -> (i32, i32) {
    %c0_i32 = arith.constant 0 : i32
    %c0_i32_0 = arith.constant 0 : i32
    %c0_i32_1 = arith.constant 0 : i32
    return %c0_i32, %c0_i32_0 : i32, i32
  }
  func.func @transform_5(%arg0: i32, %arg1: i32) -> (i32, i32) {
    %c0_i32 = arith.constant 0 : i32
    %c0_i32_0 = arith.constant 0 : i32
    %c0_i32_1 = arith.constant 0 : i32
    return %c0_i32, %c0_i32_0 : i32, i32
  }
  func.func @transform_6(%arg0: i32, %arg1: i32) -> (i32, i32) {
    %c0_i32 = arith.constant 0 : i32
    %c0_i32_0 = arith.constant 0 : i32
    %c0_i32_1 = arith.constant 0 : i32
    return %c0_i32, %c0_i32_0 : i32, i32
  }
  func.func @transform_7(%arg0: i32, %arg1: i32) -> (i32, i32, i32) {
    %c0_i32 = arith.constant 0 : i32
    %c0_i32_0 = arith.constant 0 : i32
    return %arg1, %arg0, %c0_i32 : i32, i32, i32
  }
}

</mosaic_0001>

<bundles_post_ra>
// kernel: tpu_custom_call.1
= control target key start
LH: loop header
LB: loop body
LE: loop exit
PB: predicated region body
PF: predicated region fallthrough
CT: control target
= control target key end

     0   :  { %s1591_s24 = smov 0   ;;  %s1593_s25 = smov 0   ;;  %s1804_s0 = inlined_call_operand.vmem [shape: f32[16,4], index: 0, kind: input, shape index: {}]   ;;  %s1805_s1 = inlined_call_operand.vmem [shape: f32[8,16,3], index: 1, kind: input, shape index: {}]   ;;  %s1806_s2 = inlined_call_operand.vmem [shape: f32[4,32], index: 2, kind: input, shape index: {}]   ;;  %s1807_s3 = inlined_call_operand.vmem [shape: f32[3,32], index: 3, kind: input, shape index: {}]   ;;  %s1808_s4 = inlined_call_operand.vmem [shape: f32[1,32], index: 4, kind: input, shape index: {}]   ;;  %s1809_s5 = inlined_call_operand.vmem [shape: f32[32,4], index: 5, kind: input, shape index: {}]   ;;  %s1810_s6 = inlined_call_operand.vmem [shape: f32[1,4], index: 6, kind: input, shape index: {}]   ;;  %s1811_s7 = inlined_call_operand.vmem [shape: f32[8,16,4], index: 7, kind: output, shape index: {}]  }
   0x1   :  { %s1595_s26 = smov 0   ;;  %s1597_s27 = smov 0  }
   0x2   :  { %s1599_s28 = smov 0   ;;  %s1601_s29 = smov 0  }
   0x3   :  { %s1603_s30 = smov 0  }
   0x4 LB: > { %s26_s8 = sadd.s32 1, %s1538_s28  ;;  %s29_s9 = sadd.s32 1, %s1542_s29  ;;  %s1546_s30 = sphi %s1603_s30, %s17_s30   ;;  %s1542_s29 = sphi %s1601_s29, %s1818_s29   ;;  %s1538_s28 = sphi %s1599_s28, %s1817_s28   ;;  %s1534_s27 = sphi %s1597_s27, %s1816_s27   ;;  %s1530_s26 = sphi %s1595_s26, %s1815_s26   ;;  %s1526_s25 = sphi %s1593_s25, %s1814_s25   ;;  %s1522_s24 = sphi %s1591_s24, %s1813_s24  }
   0x5   : > { %p27_p0 = scmp.ge.s32.totalorder %s26_s8, 2  ;;  %s1253_s10 = sadd.s32 4294967295, %s1546_s30  }
   0x6   : > { %p71_p1 = scmp.ne.s32.totalorder %s1526_s25, %s1522_s24  ;;  %p72_p2 = scmp.eq.s32.totalorder %s1546_s30, 0 }
   0x7   : > { %s1820_s8 = smov (%p27_p0, %s26_s8), 0  ;;  %s1822_s9 = smov (!%p27_p0, %s29_s9), %s1542_s29 }
   0x8   : > { %p31_p3 = scmp.ge.s32.totalorder %s1822_s9, 2  ;;  %p208_p4 = scmp.eq.s32.totalorder %s1253_s10, 3 }
   0x9   : > { %s59_s11 = ssub.s32 %s1538_s28, %s1820_s8  ;;  %p73_p5 = por %p72_p2, %p71_p1 }
   0xa   : > { %s1824_s9 = smov (%p31_p3, %s1822_s9), 0  ;;  %p1639_p6 = por %p208_p4, %p71_p1 }
   0xb   : > { %s60_s13 = ssub.s32 %s1542_s29, %s1824_s9  ;;  %s64_s15 = sadd.s32 1, %s1526_s25 }
   0xc   : > { %s61_s14 = sor.u32 %s60_s13, %s59_s11  ;;  %p1256_p8 = scmp.ge.s32.totalorder %s1546_s30, 4 }
   0xd   : > { %p62_p7 = scmp.eq.s32.totalorder %s61_s14, 0 }
   0xe   : > { %245 = sbr.rel (%p1256_p8) target bundleno = 29 (0x1d), region = 36 }
   0xf   : > { %s1647_s16 = scalar_select %p62_p7, %s1526_s25, %s64_s15  }
  0x15   : > { %255 = sbr.rel (!%p73_p5) target bundleno = 29 (0x1d), region = 44  ;;  %s257_s17 = sand.u32 (%p73_p5), 1, %s1526_s25  }
  0x16   : > { %s1294_s18 = sshll.u32 (%p73_p5), %s1538_s28, 3  ;;  %s1257_s19 = sshll.u32 (%p73_p5), %s257_s17, 5 }
  0x17   : > { %s262_s20 = sadd.s32 (%p73_p5), %s1542_s29, %s1294_s18  ;;  %s259_s11 = scalar_lea.vmem (%p73_p5), [#allocation4], %s1257_s19 }
  0x18   : > { %s1260_s21 = sshll.u32 (%p73_p5), %s262_s20, 3 }
  0x19   : > { %s264_s10 = scalar_lea.vmem (%p73_p5), %s1805_s1, %s1260_s21 }
  0x1a   : > { %v298_v0 = vld [vmem:[%s264_s10] sm:$0xff] (%p73_p5)  ;;  %v300_v1 = vld [vmem:[%s264_s10 + $0x10] sm:$0xff] (%p73_p5) }
  0x1b   : > { %v302_v2 = vld [vmem:[%s264_s10 + $0x20] sm:$0xff] (%p73_p5)  ;;  %299 = vst [vmem:[%s259_s11] sm:$0xff] (%p73_p5), %v298_v0  ;;  %301 = vst [vmem:[%s259_s11 + $0x8] sm:$0xff] (%p73_p5), %v300_v1  ;;  %v304_v3 = vld [vmem:[%s264_s10 + $0x30] sm:$0xff] (%p73_p5) }
  0x1c   : > { %303 = vst [vmem:[%s259_s11 + $0x10] sm:$0xff] %v302_v2  ;;  %305 = vst [vmem:[%s259_s11 + $0x18] sm:$0xff] %v304_v3 }
  0x1d PF: > { %p1261_p9 = scmp.ge.s32.totalorder %s1546_s30, 1  ;;  %p310_p10 = scmp.lt.s32.totalorder %s1546_s30, 5 }
  0x1f   : > { %p311_p11 = pnand %p1261_p9, %p310_p10 }
  0x20   : > { %s317_s13 = sand.u32 (!%p311_p11), 1, %s1522_s24   ;;  %p351_p12 = scmp.lt.s32.totalorder (!%p311_p11), %s1534_s27, 1 }
  0x21   : > { %314 = sbr.rel (%p311_p11) target bundleno = 1835 (0x72b), region = 82  ;;  %s1262_s14 = sshll.u32 (!%p311_p11), %s317_s13, 5 }
  0x22   : > { %s1664_s21 = scalar_lea.vmem (!%p311_p11), [#allocation4], %s1262_s14  ;;  %s1666_s22 = scalar_lea.vmem (!%p311_p11), [#allocation5], %s1262_s14 }
  0x23   : > { %p1265_p13 = scmp.ne.s32.totalorder (!%p311_p11), %s1530_s26, 0 }
  0x28   : > { %s352_s15 = scalar_select %p351_p12, %s1534_s27, 1 }
  0x29   : > { %360 = sbr.rel (%p1265_p13) target bundleno = 48 (0x30), region = 90  ;;  %vm362_vm0 = vcmask (!%p1265_p13), 31744  }
  0x2a   : > { %s1264_s17 = sshll.u32 %s352_s15, 3 }
  0x2b   : > { %s354_s20 = scalar_lea.vmem %s1804_s0, %s1264_s17 }
  0x2c   : > { %v361_v4 = vld [vmem:[%s354_s20] sm:$0xff] (!%p1265_p13) }
  0x2d   : > { %363 = vst.msk [vmem:[#allocation3] sm:$0xff] (!%p1265_p13), %vm362_vm0, %v361_v4 }
  0x30 PF: > { %v368_v5 = vld [vmem:[%s1807_s3] sm:$0x7]  ;;  %vm389_vm1 = vcmask 1042432   ;;  %v364_v6 = vld [vmem:[%s1664_s21] sm:$0xff]  ;;  %vm376_vm2 = vcmask 23552   ;;  %vm506_vm3 = vcmask 1043456  }
  0x31   : > { %v365_v7 = vld [vmem:[%s1664_s21 + $0x8] sm:$0xff]  ;;  %1329 = vmatprep.subr.msk.mxu0 %vm389_vm1, %v368_v5  ;;  %1331 = vmatprep.mubr.msk.f32.mxu0 %vm376_vm2, %v364_v6  ;;  %v1548_v9 = vmov 0.0   ;;  %vm502_vm4 = vcmask 31744   ;;  %vm1549_vm5 = vmmov 0   ;;  %v485_v12 = vld [vmem:[%s1809_s5 + $0x8] sm:$0xff]  ;;  %v1550_v16 = vmov 0.0|0.0  }
  0x32   : > { %v1678_v8 = vld [vmem:[%s1806_s2] sm:$0xf]  ;;  %1330 = vmatpush3.msk.msra.mxu0 %vm389_vm1, %v368_v5  ;;  %1337 = vmatprep.subr.mxu1 %v1548_v9  ;;  %v489_v14 = vmul.f32 0.1, %v485_v12  ;;  %v366_v15 = vld [vmem:[%s1664_s21 + $0x10] sm:$0xff]  ;;  %v367_v17 = vld [vmem:[%s1664_s21 + $0x18] sm:$0xff] }
  0x33   : > { %1332 = vmatmul.mubr.msk.f32.vlgmr.msra.gmra.mrb[0].mxu0 %vm376_vm2, %v365_v7  ;;  %1338 = vmatpush3.msk.msra.mxu1 %vm506_vm3, %v1678_v8  ;;  %v484_v11 = vld [vmem:[%s1809_s5] sm:$0xff]  ;;  %v486_v18 = vld [vmem:[%s1809_s5 + $0x10] sm:$0xff]  ;;  %v487_v19 = vld [vmem:[%s1809_s5 + $0x18] sm:$0xff]  ;;  %vm478_vm6 = vcmask 261120   ;;  %s1295_s13 = sshll.u32 (%p1639_p6), %s1530_s26, 3 }
  0x34   : > { %v500_v10 = vld [vmem:[#allocation3] sm:$0xff]  ;;  %1339 = vmatprep.mubr.msk.f32.mxu1 %vm1549_vm5, %v1548_v9  ;;  %1353 = vmatprep.subr.mxu1 %v1548_v9  ;;  %v488_v13 = vmul.f32 0.1, %v484_v11  ;;  %v490_v21 = vmul.f32 0.1, %v486_v18  ;;  %s1122_s14 = sadd.s32 (%p1639_p6), %s1534_s27, %s1295_s13 }
  0x35   : > { %1340 = vmatmul.mubr.msk.f32.vlgmr.msra.gmra.mrb[0].mxu1 %vm502_vm4, %v500_v10  ;;  %1401 = vmatprep.subr.bf16.mxu0 %v1550_v16  ;;  %v491_v22 = vmul.f32 0.1, %v487_v19  ;;  %v1266_v24 = vld [vmem:[%s1808_s4] ss:$0 sm:$0xff]  ;;  %s1291_s15 = sshll.u32 (%p1639_p6), %s1122_s14, 3 }
  0x36   : > { %1354 = vmatpush3.msk.msra.mxu1 %vm506_vm3, %v1678_v8  ;;  %1355 = vmatprep.mubr.msk.f32.mxu1 %vm1549_vm5, %v1548_v9  ;;  %v1708_v20 = vpack.c.bf16 %v489_v14, %v488_v13  ;;  %v1272_v38 = vld [vmem:[%s1810_s6] ss:$0 sm:$0xff]  ;;  %s1124_s19 = scalar_lea.vmem (%p1639_p6), %s1811_s7, %s1291_s15 }
  0x37   : > { %1334 = vmatprep.mubr.msk.f32.mxu0 %vm376_vm2, %v366_v15  ;;  %1407 = vmatprep.subr.bf16.mxu1 %v1550_v16  ;;  %v1715_v23 = vpack.c.bf16 %v491_v22, %v490_v21  ;;  %v499_v39 = vmul.f32 0.1, %v1272_v38 }
  0x38   : > { %1335 = vmatmul.mubr.msk.f32.gmra.mrb[2].mxu0 %vm376_vm2, %v367_v17 }
  0x39   : > { %1350 = vmatprep.mubr.msk.f32.mxu0 %vm1549_vm5, %v1548_v9  ;;  %1403 = vmatpush3.bf16.msra.mxu0 %v1708_v20 }
  0x3a   : > { %1404 = vmatprep.subr.bf16.mxu0 %v1550_v16 }
  0x3d   : > { %1406 = vmatpush3.bf16.msra.mxu0 %v1715_v23 }
  0x3e   : > { %1369 = vmatprep.subr.mxu0 %v1548_v9 }
 0x106   : > { %v1333_v25 = vpop.f32.mrb[0].mxu0 }
 0x107   : > { %v465_v26 = vadd.f32 %v1333_v25, %v1266_v24  ;;  %v459_v27 = vpop.f32.mrb[1].mxu0 }
 0x108   : > { %v460_v28 = vadd.f32 %v1266_v24, %v459_v27  ;;  %v576_v29 = vpop.f32.mrb[0].mxu1 }
 0x109   : > { %480 = vst.msk [vmem:[#allocation2 + $0x8] sm:$0xff] %vm478_vm6, %v465_v26  ;;  %v1341_v30 = vpop.f32.mrb[1].mxu1 }
 0x10a   : > { %479 = vst.msk [vmem:[#allocation2] sm:$0xff] %vm478_vm6, %v460_v28 }
 0x10b   : > { %v1336_v34 = vpop.f32.mrb[2].mxu0 }
 0x10c   : > { %v475_v35 = vadd.f32 %v1336_v34, %v1266_v24  ;;  %v469_v36 = vpop.f32.mrb[3].mxu0 }
 0x10d   : > { %v470_v37 = vadd.f32 %v1266_v24, %v469_v36 }
 0x10e   : > { %482 = vst.msk [vmem:[#allocation2 + $0x18] sm:$0xff] %vm478_vm6, %v475_v35 }
 0x10f   : > { %481 = vst.msk [vmem:[#allocation2 + $0x10] sm:$0xff] %vm478_vm6, %v470_v37 }
 0x110   : > { %v657_v44 = vld [vmem:[#allocation2 + $0x8] sm:$0xff] }
 0x111   : > { %v501_v31 = vld [vmem:[#allocation2] sm:$0xff] }
 0x112   : > { %v577_v32 = vadd.f32 %v576_v29, %v501_v31 }
 0x114   : > { %1484 = vtanh.f32 %v577_v32 }
 0x115   : > { %v961_v62 = vld [vmem:[#allocation2 + $0x18] sm:$0xff] }
 0x116   : > { %v809_v53 = vld [vmem:[#allocation2 + $0x10] sm:$0xff] }
 0x11e   : > { %v1485_v33 = vpop.eup %1484 }
 0x11f   : > { %1351 = vmatmul.mubr.msk.f32.vlgmr.msra.gmra.mrb[4].mxu0 %vm478_vm6, %v1485_v33 }
 0x120   : > { %1370 = vmatpush3.msk.msra.mxu0 %vm506_vm3, %v1678_v8  ;;  %1371 = vmatprep.mubr.msk.f32.mxu0 %vm1549_vm5, %v1548_v9 }
 0x121   : > { %1413 = vmatprep.subr.bf16.mxu0 %v1550_v16 }
 0x1f2   : > { %v650_v40 = vpop.f32.mrb[4].mxu0 }
 0x1f3   : > { %v651_v41 = vadd.f32 %v650_v40, %v499_v39  ;;  %v1352_v42 = vpop.f32.mrb[5].mxu0 }
 0x1f5   : > { %v654_v43 = vadd.f32 %v651_v41, %v500_v10 }
 0x1f7   : > { %655 = vst.msk [vmem:[%s1666_s22] sm:$0xff] %vm502_vm4, %v654_v43  ;;  %1356 = vmatmul.mubr.msk.f32.vlgmr.msra.gmra.mrb[2].mxu1 %vm502_vm4, %v654_v43 }
 0x1f8   : > { %1409 = vmatpush3.bf16.msra.mxu1 %v1708_v20  ;;  %1366 = vmatprep.mubr.msk.f32.mxu1 %vm1549_vm5, %v1548_v9 }
 0x1f9   : > { %1410 = vmatprep.subr.bf16.mxu1 %v1550_v16 }
 0x1fc   : > { %1412 = vmatpush3.bf16.msra.mxu1 %v1715_v23 }
 0x1fd   : > { %1385 = vmatprep.subr.mxu1 %v1548_v9 }
 0x1fe   : > { %v1158_v7 = vld [vmem:[%s1666_s22] sm:$0xff] (%p1639_p6) }
 0x1ff   : > { %1159 = vst [vmem:[%s1124_s19] sm:$0xff] (%p1639_p6), %v1158_v7 }
 0x2ca   : > { %v727_v45 = vpop.f32.mrb[2].mxu1 }
 0x2cb   : > { %v728_v46 = vadd.f32 %v727_v45, %v657_v44  ;;  %v1357_v47 = vpop.f32.mrb[3].mxu1 }
 0x2cd   : > { %1486 = vtanh.f32 %v728_v46 }
 0x2d7   : > { %v1487_v48 = vpop.eup %1486 }
 0x2d8   : > { %1367 = vmatmul.mubr.msk.f32.vlgmr.msra.gmra.mrb[4].mxu1 %vm478_vm6, %v1487_v48 }
 0x2d9   : > { %1386 = vmatpush3.msk.msra.mxu1 %vm506_vm3, %v1678_v8  ;;  %1387 = vmatprep.mubr.msk.f32.mxu1 %vm1549_vm5, %v1548_v9 }
 0x2da   : > { %1419 = vmatprep.subr.bf16.mxu1 %v1550_v16 }
 0x3ab   : > { %v801_v49 = vpop.f32.mrb[4].mxu1 }
 0x3ac   : > { %v802_v50 = vadd.f32 %v801_v49, %v499_v39  ;;  %v1368_v51 = vpop.f32.mrb[5].mxu1 }
 0x3ae   : > { %v805_v52 = vadd.f32 %v802_v50, %v654_v43 }
 0x3b0   : > { %1279 = vst.msk [vmem:[%s1666_s22 + $0x8] sm:$0xff] %vm502_vm4, %v805_v52  ;;  %1372 = vmatmul.mubr.msk.f32.vlgmr.msra.gmra.mrb[6].mxu0 %vm502_vm4, %v805_v52 }
 0x3b1   : > { %1415 = vmatpush3.bf16.msra.mxu0 %v1708_v20  ;;  %1382 = vmatprep.mubr.msk.f32.mxu0 %vm1549_vm5, %v1548_v9 }
 0x3b2   : > { %1416 = vmatprep.subr.bf16.mxu0 %v1550_v16 }
 0x3b5   : > { %1418 = vmatpush3.bf16.msra.mxu0 %v1715_v23 }
 0x3b7   : > { %v1160_v8 = vld [vmem:[%s1666_s22 + $0x8] sm:$0xff] (%p1639_p6) }
 0x3b8   : > { %1161 = vst [vmem:[%s1124_s19 + $0x10] sm:$0xff] (%p1639_p6), %v1160_v8 }
 0x483   : > { %v879_v54 = vpop.f32.mrb[6].mxu0 }
 0x484   : > { %v880_v55 = vadd.f32 %v879_v54, %v809_v53  ;;  %v1373_v56 = vpop.f32.mrb[7].mxu0 }
 0x486   : > { %1488 = vtanh.f32 %v880_v55 }
 0x490   : > { %v1489_v57 = vpop.eup %1488 }
 0x491   : > { %1383 = vmatmul.mubr.msk.f32.vlgmr.msra.gmra.mrb[8].mxu0 %vm478_vm6, %v1489_v57 }
 0x564   : > { %v953_v58 = vpop.f32.mrb[8].mxu0 }
 0x565   : > { %v954_v59 = vadd.f32 %v953_v58, %v499_v39  ;;  %v1384_v60 = vpop.f32.mrb[9].mxu0 }
 0x567   : > { %v957_v61 = vadd.f32 %v954_v59, %v805_v52 }
 0x569   : > { %1283 = vst.msk [vmem:[%s1666_s22 + $0x10] sm:$0xff] %vm502_vm4, %v957_v61  ;;  %1388 = vmatmul.mubr.msk.f32.vlgmr.msra.gmra.mrb[6].mxu1 %vm502_vm4, %v957_v61 }
 0x56a   : > { %1421 = vmatpush3.bf16.msra.mxu1 %v1708_v20  ;;  %1398 = vmatprep.mubr.msk.f32.mxu1 %vm1549_vm5, %v1548_v9 }
 0x56b   : > { %1422 = vmatprep.subr.bf16.mxu1 %v1550_v16 }
 0x56e   : > { %1424 = vmatpush3.bf16.msra.mxu1 %v1715_v23 }
 0x570   : > { %v1162_v9 = vld [vmem:[%s1666_s22 + $0x10] sm:$0xff] (%p1639_p6) }
 0x571   : > { %1163 = vst [vmem:[%s1124_s19 + $0x20] sm:$0xff] (%p1639_p6), %v1162_v9 }
 0x63c   : > { %v1031_v63 = vpop.f32.mrb[6].mxu1 }
 0x63d   : > { %v1032_v0 = vadd.f32 %v1031_v63, %v961_v62  ;;  %v1389_v1 = vpop.f32.mrb[7].mxu1 }
 0x63f   : > { %1490 = vtanh.f32 %v1032_v0 }
 0x649   : > { %v1491_v2 = vpop.eup %1490 }
 0x64a   : > { %1399 = vmatmul.mubr.msk.f32.vlgmr.msra.gmra.mrb[8].mxu1 %vm478_vm6, %v1491_v2 }
 0x71c   : > { %1119 = sbr.rel (!%p1639_p6) target bundleno = 1835 (0x72b), region = 94 }
 0x71d   : > { %v1105_v3 = vpop.f32.mrb[8].mxu1 }
 0x71e   : > { %v1106_v4 = vadd.f32 %v1105_v3, %v499_v39  ;;  %v1400_v5 = vpop.f32.mrb[9].mxu1 }
 0x720   : > { %v1109_v6 = vadd.f32 %v1106_v4, %v957_v61 }
 0x722   : > { %1287 = vst.msk [vmem:[%s1666_s22 + $0x18] sm:$0xff] %vm502_vm4, %v1109_v6  ;;  %1112 = vst.msk [vmem:[#allocation3] sm:$0xff] %vm502_vm4, %v1109_v6 }
 0x729   : > { %v1164_v10 = vld [vmem:[%s1666_s22 + $0x18] sm:$0xff] }
 0x72a   : > { %1165 = vst [vmem:[%s1124_s19 + $0x30] sm:$0xff] %v1164_v10 }
 0x72b PF: > { %s17_s30 = sadd.s32 1, %s1546_s30   ;;  %s1813_s24 = smov %s1526_s25 }
 0x72c   : > { %p14_p0 = scmp.ge.s32.totalorder %s17_s30, 6   ;;  %s1814_s25 = smov %s1647_s16 }
 0x72d   : > { %s1815_s26 = smov %s1538_s28  ;;  %s1816_s27 = smov %s1542_s29 }
 0x72e   : > { %s1817_s28 = smov %s1820_s8  ;;  %s1818_s29 = smov %s1824_s9 }
 0x72f   :  { %16 = sbr.rel (!%p14_p0) target bundleno = 4 (0x4), region = 172 }

</bundles_post_ra>
